<compile_context>
chip_gen: v6e
topology: v6e:2x2x1
jax: 0.10.0
libtpu: 0.0.40
codegen_flags: <defaults>
</compile_context>

<pallas_src>
import functools

import jax
import jax.numpy as jnp
from jax.experimental import pallas as pl
from jax.experimental.pallas import tpu as pltpu


# ----------------------------- Pallas kernel --------------------------------

def _gemm_bias_act_kernel(w_ref, p_ref, b_ref, o_ref, *, activation):
    """One output tile of activation(W @ P + b).

    w_ref: (oc_tile, K) bf16     p_ref: (K, M) bf16
    b_ref: (oc_tile, 1) f32      o_ref: (oc_tile, M)
    M (lane dim) is a multiple of 128 -> dense stores; f32 MXU accumulation.
    """
    acc = jnp.dot(w_ref[...], p_ref[...], preferred_element_type=jnp.float32)
    acc = acc + b_ref[...]                      # broadcast along lanes, f32
    if activation == "relu":
        acc = jnp.maximum(acc, 0.0)
    elif activation == "tanh":
        acc = jnp.tanh(acc)                     # EUP, f32
    o_ref[...] = acc.astype(o_ref.dtype)


# ------------------------------ conv1 + ReLU ---------------------------------

def _conv1_relu(x, w1, b1):
    """Conv2d(3,64,k=4,s=2,p=1) + ReLU. Returns h^T of shape (OC, N*OH*OW), bf16."""
    n, ic, h, w = x.shape
    oc, _, k, _ = w1.shape
    oh, ow = h // 2, w // 2
    m = n * oh * ow

    # im2col (transposed): Pt[k_idx, m], k_idx = ic*16 + ky*4 + kx, m = n*oh*ow + qy*ow + qx
    xpad = jnp.pad(x, ((0, 0), (0, 0), (1, 1), (1, 1)))
    taps = [xpad[:, :, ky:ky + 2 * oh:2, kx:kx + 2 * ow:2]      # (n, ic, oh, ow)
            for ky in range(k) for kx in range(k)]
    pt = jnp.stack(taps, axis=2)                                 # (n, ic, k*k, oh, ow)
    pt = pt.reshape(n, ic * k * k, oh * ow)
    pt = pt.transpose(1, 0, 2).reshape(ic * k * k, m).astype(jnp.bfloat16)
    wm = w1.reshape(oc, ic * k * k).astype(jnp.bfloat16)         # (OC, K), same K order
    bias = b1.reshape(oc, 1).astype(jnp.float32)

    oc_tile = oc // 2 if oc % 2 == 0 else oc    # grid >= 2 -> both v7x TCs busy
    kk = ic * k * k
    kernel = functools.partial(_gemm_bias_act_kernel, activation="relu")
    h_t = pl.pallas_call(
        kernel,
        out_shape=jax.ShapeDtypeStruct((oc, m), jnp.bfloat16),
        grid=(oc // oc_tile,),
        in_specs=[
            pl.BlockSpec((oc_tile, kk), lambda i: (i, 0)),       # weight OC-tile
            pl.BlockSpec((kk, m), lambda i: (0, 0)),             # full patch matrix
            pl.BlockSpec((oc_tile, 1), lambda i: (i, 0)),        # bias column
        ],
        out_specs=pl.BlockSpec((oc_tile, m), lambda i: (i, 0)),
        compiler_params=pltpu.CompilerParams(dimension_semantics=("parallel",)),
    )(wm, pt, bias)
    return h_t, (n, oc, oh, ow)


# -------------------- deconv (sub-pixel) + Tanh -------------------------------

def _deconv_tanh(h_t, h_meta, w2, b2):
    """ConvTranspose2d(64,3,k=4,s=2,p=1) + Tanh via stride^2=4 sub-pixel phases.

    Each phase (py,px) is a stride-1 conv with a 2x2 sub-filter taken from the
    (flipped) transposed-conv weight; phase outputs interleave into the 2x map.
    """
    n, ic, ih, iw = h_meta
    _, oc, k, _ = w2.shape                      # PyTorch ConvTranspose2d: (IC, OC, K, K)
    s = 2
    m = n * ih * iw

    h4 = h_t.reshape(ic, n, ih, iw).transpose(1, 0, 2, 3)        # (n, ic, ih, iw) bf16
    hpad = jnp.pad(h4, ((0, 0), (0, 0), (1, 1), (1, 1)))

    phase_p, phase_w = [], []
    for py in range(s):
        for px in range(s):
            taps = [hpad[:, :, py + dy:py + dy + ih, px + dx:px + dx + iw]
                    for dy in range(2) for dx in range(2)]       # (n, ic, ih, iw) each
            t = jnp.stack(taps, axis=2).reshape(n, ic * 4, ih * iw)
            phase_p.append(t.transpose(1, 0, 2).reshape(ic * 4, m))
            # weight taps: ky = 3 - py - 2*dy, kx = 3 - px - 2*dx (k=4, s=2, pad=1)
            wt = [w2[:, :, 3 - py - 2 * dy, 3 - px - 2 * dx]     # (ic, oc) each
                  for dy in range(2) for dx in range(2)]
            phase_w.append(jnp.stack(wt, axis=1).reshape(ic * 4, oc).T)   # (oc, ic*4)

    pt = jnp.stack(phase_p, axis=0).astype(jnp.bfloat16)         # (4, ic*4, M)
    wm = jnp.stack(phase_w, axis=0).astype(jnp.bfloat16)         # (4, oc, ic*4)
    bias = b2.reshape(oc, 1).astype(jnp.float32)

    kk = ic * 4
    kernel = functools.partial(_gemm_bias_act_kernel, activation="tanh")
    y_ph = pl.pallas_call(
        kernel,
        out_shape=jax.ShapeDtypeStruct((s * s, oc, m), jnp.float32),
        grid=(s * s,),                           # 4 phases, independent ("parallel")
        in_specs=[
            pl.BlockSpec((None, oc, kk), lambda p: (p, 0, 0)),   # phase sub-filter
            pl.BlockSpec((None, kk, m), lambda p: (p, 0, 0)),    # phase patches
            pl.BlockSpec((oc, 1), lambda p: (0, 0)),             # shared bias
        ],
        out_specs=pl.BlockSpec((None, oc, m), lambda p: (p, 0, 0)),
        compiler_params=pltpu.CompilerParams(dimension_semantics=("parallel",)),
    )(wm, pt, bias)                                              # (4, oc, M) f32

    # pixel shuffle: (py*2+px, oc, n*ih*iw) -> (n, oc, 2*ih, 2*iw)
    y = y_ph.reshape(s, s, oc, n, ih, iw).transpose(3, 2, 4, 0, 5, 1)
    return y.reshape(n, oc, s * ih, s * iw)


# ------------------------------ forward pass ---------------------------------

def generator_forward(x, params):
    h_t, h_meta = _conv1_relu(x, params["w1"], params["b1"])     # Conv2d + ReLU (fused)
    return _deconv_tanh(h_t, h_meta, params["w2"], params["b2"])  # ConvT + Tanh (fused)


def init_params(key):
    k1, k2, k3, k4 = jax.random.split(key, 4)
    # PyTorch shapes: Conv2d weight (OC, IC, K, K); ConvTranspose2d weight (IC, OC, K, K)
    return {
        "w1": 0.05 * jax.random.normal(k1, (64, 3, 4, 4), jnp.float32),
        "b1": 0.05 * jax.random.normal(k2, (64,), jnp.float32),
        "w2": 0.05 * jax.random.normal(k3, (64, 3, 4, 4), jnp.float32),
        "b2": 0.05 * jax.random.normal(k4, (3,), jnp.float32),
    }


# --------------------------- reference (pure JAX, f32) ------------------------

def _reference_forward(x, params):
    dn = ("NCHW", "OIHW", "NCHW")
    h = jax.lax.conv_general_dilated(
        x, params["w1"], window_strides=(2, 2), padding=[(1, 1), (1, 1)],
        dimension_numbers=dn) + params["b1"][None, :, None, None]
    h = jnp.maximum(h, 0.0)
    w_eq = jnp.transpose(params["w2"], (1, 0, 2, 3))[:, :, ::-1, ::-1]
    y = jax.lax.conv_general_dilated(
        h, w_eq, window_strides=(1, 1), padding=[(2, 2), (2, 2)],
        lhs_dilation=(2, 2), dimension_numbers=dn) + params["b2"][None, :, None, None]
    return jnp.tanh(y)


if __name__ == "__main__":
    key = jax.random.PRNGKey(0)
    kx, kp = jax.random.split(key)
    x = jax.random.normal(kx, (2, 3, 16, 16), jnp.float32)   # NCHW, like PyTorch
    params = init_params(kp)

    fwd = jax.jit(generator_forward)
    out = jax.block_until_ready(fwd(x, params))
    assert out.shape == (2, 3, 16, 16), out.shape

    ref = jax.block_until_ready(_reference_forward(x, params))
    err = float(jnp.max(jnp.abs(out - ref)))
    # bf16 MXU inputs (f32 accumulate/epilogue) -> loosened vs pure-f32 1e-4 check.
    assert err < 3e-2, err

    print("KERNEL_OK")
</pallas_src>

<mosaic_0001>
module attributes {stable_mosaic.version = 11 : i64} {
  func.func @_gemm_bias_act_kernel(%arg0: i32, %arg1: memref<32x48xbf16, #tpu.memory_space<vmem>>, %arg2: memref<48x128xbf16, #tpu.memory_space<vmem>>, %arg3: memref<32x1xf32, #tpu.memory_space<vmem>>, %arg4: memref<32x128xbf16, #tpu.memory_space<vmem>>) attributes {dimension_semantics = [#tpu.dimension_semantics<parallel>], iteration_bounds = array<i64: 2>, scalar_prefetch = 0 : i64, scratch_operands = 0 : i64, tpu.core_type = #tpu.core_type<tc>, window_params = [{transform_indices = @transform_0, window_bounds = array<i64: 32, 48>}, {pipeline_mode = #tpu.pipeline_mode<synchronous>, transform_indices = @transform_1, window_bounds = array<i64: 48, 128>}, {transform_indices = @transform_2, window_bounds = array<i64: 32, 1>}, {transform_indices = @transform_3, window_bounds = array<i64: 32, 128>}]} {
    %c0 = arith.constant 0 : index
    %c0_0 = arith.constant 0 : index
    %0 = vector.load %arg1[%c0, %c0_0] : memref<32x48xbf16, #tpu.memory_space<vmem>>, vector<32x48xbf16>
    %c0_1 = arith.constant 0 : index
    %c0_2 = arith.constant 0 : index
    %1 = vector.load %arg2[%c0_1, %c0_2] : memref<48x128xbf16, #tpu.memory_space<vmem>>, vector<48x128xbf16>
    %cst = arith.constant dense<0.000000e+00> : vector<32x128xf32>
    %2 = tpu.matmul %0, %1, %cst {dimension_numbers = #tpu.dot_dimension_numbers<[1], [0], [0], [1], [0, 0, 1, 1], [], []>} : vector<32x48xbf16>, vector<48x128xbf16>, vector<32x128xf32> -> vector<32x128xf32>
    %c0_3 = arith.constant 0 : index
    %c0_4 = arith.constant 0 : index
    %3 = vector.load %arg3[%c0_3, %c0_4] : memref<32x1xf32, #tpu.memory_space<vmem>>, vector<32x1xf32>
    %4 = vector.broadcast %3 : vector<32x1xf32> to vector<32x128xf32>
    %5 = arith.addf %2, %4 : vector<32x128xf32>
    %cst_5 = arith.constant 0.000000e+00 : f32
    %6 = vector.broadcast %cst_5 : f32 to vector<32x128xf32>
    %7 = arith.maximumf %5, %6 : vector<32x128xf32>
    %8 = arith.truncf %7 : vector<32x128xf32> to vector<32x128xbf16>
    %c0_6 = arith.constant 0 : index
    %c0_7 = arith.constant 0 : index
    %9 = vector.load %arg4[%c0_6, %c0_7] : memref<32x128xbf16, #tpu.memory_space<vmem>>, vector<32x128xbf16>
    tpu.vector_store %arg4[%c0_6, %c0_7], %8 {strides = array<i32>} : memref<32x128xbf16, #tpu.memory_space<vmem>>, vector<32x128xbf16>,
    return
  }
  func.func @transform_0(%arg0: i32) -> (i32, i32) {
    %c0_i32 = arith.constant 0 : i32
    %c0_i32_0 = arith.constant 0 : i32
    return %arg0, %c0_i32 : i32, i32
  }
  func.func @transform_1(%arg0: i32) -> (i32, i32) {
    %c0_i32 = arith.constant 0 : i32
    %c0_i32_0 = arith.constant 0 : i32
    %c0_i32_1 = arith.constant 0 : i32
    return %c0_i32, %c0_i32_0 : i32, i32
  }
  func.func @transform_2(%arg0: i32) -> (i32, i32) {
    %c0_i32 = arith.constant 0 : i32
    %c0_i32_0 = arith.constant 0 : i32
    return %arg0, %c0_i32 : i32, i32
  }
  func.func @transform_3(%arg0: i32) -> (i32, i32) {
    %c0_i32 = arith.constant 0 : i32
    %c0_i32_0 = arith.constant 0 : i32
    return %arg0, %c0_i32 : i32, i32
  }
}

module attributes {stable_mosaic.version = 11 : i64} {
  func.func @_gemm_bias_act_kernel(%arg0: i32, %arg1: memref<1x3x256xbf16, #tpu.memory_space<vmem>>, %arg2: memref<1x256x128xbf16, #tpu.memory_space<vmem>>, %arg3: memref<3x1xf32, #tpu.memory_space<vmem>>, %arg4: memref<1x3x128xf32, #tpu.memory_space<vmem>>) attributes {dimension_semantics = [#tpu.dimension_semantics<parallel>], iteration_bounds = array<i64: 4>, scalar_prefetch = 0 : i64, scratch_operands = 0 : i64, tpu.core_type = #tpu.core_type<tc>, window_params = [{transform_indices = @transform_0, window_bounds = array<i64: 1, 3, 256>}, {transform_indices = @transform_1, window_bounds = array<i64: 1, 256, 128>}, {pipeline_mode = #tpu.pipeline_mode<synchronous>, transform_indices = @transform_2, window_bounds = array<i64: 3, 1>}, {transform_indices = @transform_3, window_bounds = array<i64: 1, 3, 128>}]} {
    %c0 = arith.constant 0 : index
    %c0_0 = arith.constant 0 : index
    %c0_1 = arith.constant 0 : index
    %0 = vector.load %arg1[%c0, %c0_0, %c0_1] : memref<1x3x256xbf16, #tpu.memory_space<vmem>>, vector<1x3x256xbf16>
    %1 = vector.shape_cast %0 : vector<1x3x256xbf16> to vector<3x256xbf16>
    %c0_2 = arith.constant 0 : index
    %c0_3 = arith.constant 0 : index
    %c0_4 = arith.constant 0 : index
    %2 = vector.load %arg2[%c0_2, %c0_3, %c0_4] : memref<1x256x128xbf16, #tpu.memory_space<vmem>>, vector<1x256x128xbf16>
    %3 = vector.shape_cast %2 : vector<1x256x128xbf16> to vector<256x128xbf16>
    %cst = arith.constant dense<0.000000e+00> : vector<3x128xf32>
    %4 = tpu.matmul %1, %3, %cst {dimension_numbers = #tpu.dot_dimension_numbers<[1], [0], [0], [1], [0, 0, 1, 1], [], []>} : vector<3x256xbf16>, vector<256x128xbf16>, vector<3x128xf32> -> vector<3x128xf32>
    %c0_5 = arith.constant 0 : index
    %c0_6 = arith.constant 0 : index
    %5 = vector.load %arg3[%c0_5, %c0_6] : memref<3x1xf32, #tpu.memory_space<vmem>>, vector<3x1xf32>
    %6 = vector.broadcast %5 : vector<3x1xf32> to vector<3x128xf32>
    %7 = arith.addf %4, %6 : vector<3x128xf32>
    %8 = math.tanh %7 : vector<3x128xf32>
    %c0_7 = arith.constant 0 : index
    %c0_8 = arith.constant 0 : index
    %c0_9 = arith.constant 0 : index
    %9 = vector.load %arg4[%c0_7, %c0_8, %c0_9] : memref<1x3x128xf32, #tpu.memory_space<vmem>>, vector<1x3x128xf32>
    %10 = vector.shape_cast %9 : vector<1x3x128xf32> to vector<3x128xf32>
    %11 = vector.shape_cast %8 : vector<3x128xf32> to vector<1x3x128xf32>
    tpu.vector_store %arg4[%c0_7, %c0_8, %c0_9], %11 {strides = array<i32>} : memref<1x3x128xf32, #tpu.memory_space<vmem>>, vector<1x3x128xf32>,
    return
  }
  func.func @transform_0(%arg0: i32) -> (i32, i32, i32) {
    %c0_i32 = arith.constant 0 : i32
    %c0_i32_0 = arith.constant 0 : i32
    %c0_i32_1 = arith.constant 0 : i32
    return %arg0, %c0_i32, %c0_i32_0 : i32, i32, i32
  }
  func.func @transform_1(%arg0: i32) -> (i32, i32, i32) {
    %c0_i32 = arith.constant 0 : i32
    %c0_i32_0 = arith.constant 0 : i32
    %c0_i32_1 = arith.constant 0 : i32
    return %arg0, %c0_i32, %c0_i32_0 : i32, i32, i32
  }
  func.func @transform_2(%arg0: i32) -> (i32, i32) {
    %c0_i32 = arith.constant 0 : i32
    %c0_i32_0 = arith.constant 0 : i32
    %c0_i32_1 = arith.constant 0 : i32
    return %c0_i32, %c0_i32_0 : i32, i32
  }
  func.func @transform_3(%arg0: i32) -> (i32, i32, i32) {
    %c0_i32 = arith.constant 0 : i32
    %c0_i32_0 = arith.constant 0 : i32
    %c0_i32_1 = arith.constant 0 : i32
    return %arg0, %c0_i32, %c0_i32_0 : i32, i32, i32
  }
}

</mosaic_0001>

<bundles_post_ra>
// kernel: generator_forward.2
= control target key start
LH: loop header
LB: loop body
LE: loop exit
PB: predicated region body
PF: predicated region fallthrough
CT: control target
= control target key end

     0   :  { %s506_s12 = smov 0   ;;  %s543_s0 = inlined_call_operand.vmem [shape: bf16[64,48], index: 0, kind: input, shape index: {}]   ;;  %s544_s1 = inlined_call_operand.vmem [shape: bf16[48,128], index: 1, kind: input, shape index: {}]   ;;  %s545_s2 = inlined_call_operand.vmem [shape: f32[64,1], index: 2, kind: input, shape index: {}]   ;;  %s546_s3 = inlined_call_operand.vmem [shape: bf16[64,128], index: 3, kind: output, shape index: {}]  }
   0x1 LB: > { %s407_s13 = sadd.s32 4294967295, %s483_s12   ;;  %p411_p0 = scmp.ge.s32.totalorder %s483_s12, 1  ;;  %s483_s12 = sphi %s506_s12, %s13_s12  }
   0x2   : > { %p149_p1 = scmp.lt.s32.totalorder %s483_s12, 3 }
   0x4   : > { %p150_p2 = pnand %p411_p0, %p149_p1 }
   0x5   : > { %s412_s16 = sshll.u32 (!%p150_p2), %s407_s13, 2 }
   0x6   : > { %153 = sbr.rel (%p150_p2) target bundleno = 230 (0xe6), region = 32  ;;  %p179_p3 = scmp.lt.s32.totalorder (!%p150_p2), %s412_s16, 7 }
   0xb   : > { %v472_v0 = vld [vmem:[%s544_s1 + $0x10] sm:$0xff]   ;;  %v473_v1 = vld [vmem:[%s544_s1 + $0x8] sm:$0xff]   ;;  %s548_s16 = smov (!%p179_p3, %s412_s16), 7  ;;  %v474_v2 = vld [vmem:[%s544_s1] sm:$0xff]   ;;  %v485_v3 = vmov 0   ;;  %vm259_vm0 = vcmask 392192  }
   0xc   : > { %451 = vmatprep.subr.bf16.mxu0 %v472_v0  ;;  %470 = vset.pattern.permute.xlu0 %v485_v3  ;;  %s413_s21 = sshll.u32 %s548_s16, 2  ;;  %s415_s22 = sshll.u32 %s548_s16, 3 }
   0xd   : > { %452 = vmatpush3.bf16.msra.mxu0 %v472_v0  ;;  %471 = vset.pattern.permute.xlu1 %v485_v3  ;;  %s182_s25 = scalar_lea.vmem %s543_s0, %s413_s21  ;;  %s188_s28 = scalar_lea.vmem %s545_s2, %s415_s22 }
   0xe   : > { %453 = vmatprep.subr.bf16.mxu0 %v473_v1  ;;  %v475_v4 = vld [vmem:[%s182_s25] sm:$0xff]   ;;  %v209_v6 = vld [vmem:[%s188_s28 + $0x10] sm:$0xff]  ;;  %v476_v7 = vld [vmem:[%s182_s25 + $0x8] sm:$0xff]   ;;  %s194_s4 = scalar_lea.vmem %s546_s3, %s413_s21 }
   0xf   : > { %457 = vmatprep.mubr.msk.bf16.mxu0 %vm259_vm0, %v475_v4  ;;  %v207_v5 = vld [vmem:[%s188_s28] sm:$0xff]  ;;  %223 = vperm.xlu1 %471, %v209_v6   ;;  %v208_v8 = vld [vmem:[%s188_s28 + $0x8] sm:$0xff]  ;;  %v210_v9 = vld [vmem:[%s188_s28 + $0x18] sm:$0xff] }
  0x10   : > { %213 = vperm.xlu0 %470, %v207_v5  }
  0x11   : > { %454 = vmatpush3.bf16.msra.mxu0 %v473_v1 }
  0x12   : > { %455 = vmatprep.subr.bf16.mxu0 %v474_v2 }
  0x13   : > { %228 = vperm.xlu1 %471, %v210_v9  }
  0x14   : > { %218 = vperm.xlu0 %470, %v208_v8  }
  0x15   : > { %456 = vmatpush3.bf16.msra.mxu0 %v474_v2 }
  0x18   : > { %458 = vmatmul.mubr.msk.bf16.vlgmr.msra.gmra.mxu0 %vm259_vm0, %v476_v7 }
  0x8a   : > { %v224_v10 = vpop.permute.xlu1 %223 }
  0x8b   : > { %v214_v11 = vpop.permute.xlu0 %213 }
  0x8e   : > { %v229_v14 = vpop.permute.xlu1 %228 }
  0x8f   : > { %v219_v19 = vpop.permute.xlu0 %218 }
  0xd8   : > { %v459_v12 = vpop.f32.mrf.mxu0 }
  0xd9   : > { %v309_v18 = vadd.f32 %v459_v12, %v224_v10 }
  0xda   : > { %v300_v13 = vpop.f32.mrf.mxu0 }
  0xdb   : > { %v301_v16 = vadd.f32 %v300_v13, %v214_v11  ;;  %v317_v25 = vmax.f32 %v309_v18, 0.0 }
  0xdc   : > { %v460_v15 = vpop.f32.mrf.mxu0 }
  0xdd   : > { %v312_v17 = vadd.f32 %v460_v15, %v229_v14  ;;  %v315_v23 = vmax.f32 %v301_v16, 0.0 }
  0xde   : > { %v303_v20 = vpop.f32.mrf.mxu0 }
  0xdf   : > { %v304_v21 = vadd.f32 %v303_v20, %v219_v19  ;;  %v318_v22 = vmax.f32 %v312_v17, 0.0 }
  0xe1   : > { %v316_v24 = vmax.f32 %v304_v21, 0.0  ;;  %v443_v27 = vpack.c.bf16 %v318_v22, %v317_v25 }
  0xe3   : > { %v438_v26 = vpack.c.bf16 %v316_v24, %v315_v23  ;;  %445 = vst [vmem:[%s194_s4 + $0x8] sm:$0xff] %v443_v27  }
  0xe5   : > { %439 = vst [vmem:[%s194_s4] sm:$0xff] %v438_v26  }
  0xe6 PF: > { %s13_s12 = sadd.s32 1, %s483_s12  }
  0xe7   : > { %p10_p4 = scmp.ge.s32.totalorder %s13_s12, 4  }
  0xe9   :  { %12 = sbr.rel (!%p10_p4) target bundleno = 1 (0x1), region = 65 }

// kernel: generator_forward.3
= control target key start
LH: loop header
LB: loop body
LE: loop exit
PB: predicated region body
PF: predicated region fallthrough
CT: control target
= control target key end

     0   :  { %s553_s12 = smov 0   ;;  %s602_s0 = inlined_call_operand.vmem [shape: bf16[4,3,256], index: 0, kind: input, shape index: {}]   ;;  %s603_s1 = inlined_call_operand.vmem [shape: bf16[4,256,128], index: 1, kind: input, shape index: {}]   ;;  %s604_s2 = inlined_call_operand.vmem [shape: f32[3,1], index: 2, kind: input, shape index: {}]   ;;  %s605_s3 = inlined_call_operand.vmem [shape: f32[4,3,128], index: 3, kind: output, shape index: {}]  }
   0x1 LB: > { %s443_s13 = sadd.s32 4294967295, %s530_s12   ;;  %p447_p0 = scmp.ge.s32.totalorder %s530_s12, 1  ;;  %s530_s12 = sphi %s553_s12, %s13_s12  }
   0x2   : > { %p147_p1 = scmp.lt.s32.totalorder %s530_s12, 5 }
   0x4   : > { %p148_p2 = pnand %p447_p0, %p147_p1 }
   0x5   : > { %p175_p3 = scmp.lt.s32.totalorder (!%p148_p2), %s443_s13, 3 }
   0x6   : > { %151 = sbr.rel (%p148_p2) target bundleno = 261 (0x105), region = 32 }
   0xb   : > { %v223_v0 = vld [vmem:[%s604_s2] sm:$0x7]  ;;  %v532_v1 = vmov 0   ;;  %s607_s13 = smov (!%p175_p3, %s443_s13), 3 }
   0xc   : > { %505 = vset.pattern.permute.xlu0 %v532_v1  ;;  %s473_s16 = sshll.u32 %s607_s13, 7  ;;  %s472_s20 = sshll.u32 %s607_s13, 2 }
   0xd   : > { %226 = vperm.xlu0 %505, %v223_v0   ;;  %s570_s19 = scalar_lea.vmem %s603_s1, %s473_s16  ;;  %s179_s23 = scalar_lea.vmem %s602_s0, %s472_s20 }
   0xe   : > { %v506_v2 = vld [vmem:[%s570_s19 + $0x78] sm:$0xff]   ;;  %v508_v4 = vld [vmem:[%s570_s19 + $0x70] sm:$0xff]   ;;  %v510_v6 = vld [vmem:[%s570_s19 + $0x68] sm:$0xff]   ;;  %s188_s26 = scalar_lea.vmem %s605_s3, %s472_s20 }
   0xf   : > { %v507_v3 = vld [vmem:[%s570_s19 + $0x38] sm:$0xff]   ;;  %474 = vmatprep.subr.bf16.mxu0 %v506_v2  ;;  %v509_v5 = vld [vmem:[%s570_s19 + $0x30] sm:$0xff]   ;;  %v511_v7 = vld [vmem:[%s570_s19 + $0x28] sm:$0xff]  }
  0x10   : > { %475 = vmatpush3.bf16.msra.mxu0 %v507_v3  ;;  %v512_v8 = vld [vmem:[%s570_s19 + $0x60] sm:$0xff]   ;;  %v514_v10 = vld [vmem:[%s570_s19 + $0x58] sm:$0xff]   ;;  %v516_v12 = vld [vmem:[%s570_s19 + $0x50] sm:$0xff]  }
  0x11   : > { %476 = vmatprep.subr.bf16.mxu0 %v508_v4  ;;  %v513_v9 = vld [vmem:[%s570_s19 + $0x20] sm:$0xff]   ;;  %v515_v11 = vld [vmem:[%s570_s19 + $0x18] sm:$0xff]   ;;  %v517_v15 = vld [vmem:[%s570_s19 + $0x10] sm:$0xff]  }
  0x12   : > { %v453_v13 = vld.sshfl [vmem:[%s179_s23] sm:$0x33 pattern:$0x76325410]  ;;  %v518_v16 = vld [vmem:[%s570_s19 + $0x48] sm:$0xff]  }
  0x13   : > { %v237_v14 = vcombine.high %v453_v13, %v453_v13  ;;  %v519_v17 = vld [vmem:[%s570_s19 + $0x8] sm:$0xff]   ;;  %v520_v18 = vld [vmem:[%s570_s19 + $0x40] sm:$0xff]  }
  0x14   : > { %477 = vmatpush3.bf16.msra.mxu0 %v509_v5  ;;  %v521_v19 = vld [vmem:[%s570_s19] sm:$0xff]  }
  0x15   : > { %478 = vmatprep.subr.bf16.mxu0 %v510_v6  ;;  %368 = vmatprep.mubr.bf16.mxu0 %v237_v14 }
  0x18   : > { %479 = vmatpush3.bf16.msra.mxu0 %v511_v7 }
  0x19   : > { %480 = vmatprep.subr.bf16.mxu0 %v512_v8 }
  0x1c   : > { %481 = vmatpush3.bf16.msra.mxu0 %v513_v9 }
  0x1d   : > { %482 = vmatprep.subr.bf16.mxu0 %v514_v10 }
  0x20   : > { %483 = vmatpush3.bf16.msra.mxu0 %v515_v11 }
  0x21   : > { %484 = vmatprep.subr.bf16.mxu0 %v516_v12 }
  0x24   : > { %485 = vmatpush3.bf16.msra.mxu0 %v517_v15 }
  0x25   : > { %486 = vmatprep.subr.bf16.mxu0 %v518_v16 }
  0x28   : > { %487 = vmatpush3.bf16.msra.mxu0 %v519_v17 }
  0x29   : > { %488 = vmatprep.subr.bf16.mxu0 %v520_v18 }
  0x2c   : > { %489 = vmatpush3.bf16.msra.mxu0 %v521_v19 }
  0x2f   : > { %369 = vmatmul.mubr.bf16.vlgmr.msra.gmra.mxu0 %v453_v13 }
  0x88   : > { %v227_v22 = vpop.permute.xlu0 %226 }
  0xef   : > { %v490_v20 = vpop.f32.mrf.mxu0 }
  0xf1   : > { %v491_v21 = vpop.f32.mrf.mxu0 }
  0xf2   : > { %v492_v23 = vadd.f32 %v491_v21, %v490_v20 }
  0xf3   : > { %v493_v24 = vpop.f32.mrf.mxu0 }
  0xf4   : > { %v371_v25 = vadd.f32 %v492_v23, %v227_v22 }
  0xf5   : > { %v494_v26 = vpop.f32.mrf.mxu0 }
  0xf6   : > { %522 = vtanh.f32 %v371_v25 }
 0x103   : > { %v523_v27 = vpop.eup %522 }
 0x104   : > { %377 = vst [vmem:[%s188_s26] sm:$0x7] %v523_v27 }
 0x105 PF: > { %s13_s12 = sadd.s32 1, %s530_s12  }
 0x106   : > { %p10_p4 = scmp.ge.s32.totalorder %s13_s12, 6  }
 0x108   :  { %12 = sbr.rel (!%p10_p4) target bundleno = 1 (0x1), region = 65 }

</bundles_post_ra>
